<compile_context>
chip_gen: v6e
topology: v6e:2x2x1
jax: 0.10.0
libtpu: 0.0.40
codegen_flags: <defaults>
</compile_context>

<pallas_src>
import functools
import math

import jax
import jax.numpy as jnp
from jax.experimental import pallas as pl
from jax.experimental.pallas import tpu as pltpu


# ----------------------------------------------------------------------------
# Kernels
# ----------------------------------------------------------------------------
def _pe_add_kernel(x_ref, pe_ref, o_ref):
    # x_ref: (1, TS, D) / (B, S, D) / (1, T) / (B, N); pe_ref broadcasts into it.
    x = x_ref[...]
    o_ref[...] = (x + pe_ref[...].astype(x.dtype)).astype(o_ref.dtype)


def _pe_add_dropout_kernel(seed_ref, x_ref, pe_ref, o_ref, *, rate):
    # Training-mode inverted dropout using the stateful TPU hardware PRNG.
    # Mix both grid axes into the seed so every (tile, batch) block gets an
    # independent stream.
    pltpu.prng_seed(
        seed_ref[0] + pl.program_id(0) * pl.num_programs(1) + pl.program_id(1)
    )
    x = x_ref[...]
    y = x + pe_ref[...].astype(x.dtype)

    bits = pltpu.prng_random_bits(y.shape)
    if bits.dtype != jnp.uint32:
        bits = pltpu.bitcast(bits, jnp.uint32)

    # Clamp so tiny rates cannot wrap uint32 (which would drop everything).
    thresh = jnp.uint32(min(int(round((1.0 - rate) * float(2**32))), 2**32 - 1))
    inv_keep = jnp.asarray(1.0 / (1.0 - rate), y.dtype)
    o_ref[...] = jnp.where(bits < thresh, y * inv_keep, jnp.zeros_like(y)).astype(
        o_ref.dtype
    )


# ----------------------------------------------------------------------------
# Parameter (buffer) construction — matches the torch init exactly
# ----------------------------------------------------------------------------
def make_positional_encoding(d_model: int, sequence_length: int) -> jnp.ndarray:
    position = jnp.arange(sequence_length, dtype=jnp.float32)[:, None]        # (S, 1)
    div_term = jnp.exp(
        jnp.arange(0, d_model, 2, dtype=jnp.float32) * (-math.log(10000.0) / d_model)
    )                                                                          # (D/2,)
    pe = jnp.zeros((sequence_length, d_model), jnp.float32)
    pe = pe.at[:, 0::2].set(jnp.sin(position * div_term))
    pe = pe.at[:, 1::2].set(jnp.cos(position * div_term))
    return pe  # torch `pe.squeeze(1)` -> shape (S, D)


# ----------------------------------------------------------------------------
# Tiling helpers
# ----------------------------------------------------------------------------
_SMALL_PROBLEM_BYTES = 2 << 20   # below this, collapse to a single block


def _device_tile_budget():
    """Return (target tile bytes, vmem_limit_bytes or None) per TPU generation."""
    kind = ""
    try:
        kind = jax.devices()[0].device_kind.lower()
    except Exception:
        pass
    if "v7" in kind or "tpu7" in kind or "7x" in kind:
        # 6 MiB tiles: x/out/pe double-buffered ~= 36 MiB < 64 MiB physical VMEM.
        return 6 << 20, 48 << 20
    if "v6" in kind:
        # 4 MiB tiles: ~24 MiB footprint fits the 32 MiB scoped default.
        return 4 << 20, None
    if "v5" in kind:
        # 2 MiB tiles (~12 MiB footprint); state the 16 MiB limit explicitly.
        return 2 << 20, 16 << 20
    # Unknown backend (e.g. CPU interpret): conservative defaults.
    return 2 << 20, None


def _sublane_step(itemsize: int) -> int:
    # Rows per packed vreg: 8 (f32), 16 (bf16/f16), 32 (int8/fp8).
    return max(8, 32 // max(int(itemsize), 1))


def _choose_seq_tile(S: int, D: int, itemsize: int, target_bytes: int) -> int:
    """Largest packed-sublane multiple whose (TS, D) tile fits target_bytes."""
    step = _sublane_step(itemsize)
    row_bytes = max(D * itemsize, 1)
    ts = (target_bytes // row_bytes) // step * step
    ts = max(step, int(ts))
    return S if ts >= S else ts


def _choose_flat_tile(N: int, itemsize: int, target_bytes: int) -> int:
    """Largest full-vreg multiple (elements) whose tile fits target_bytes."""
    step = _sublane_step(itemsize) * 128
    t = (target_bytes // max(itemsize, 1)) // step * step
    t = max(step, int(t))
    return N if t >= N else t


# ----------------------------------------------------------------------------
# Wrapper
# ----------------------------------------------------------------------------
def positional_encoding_forward(
    x: jnp.ndarray,
    pe: jnp.ndarray,
    *,
    dropout_rate: float = 0.2,
    training: bool = False,
    seed: int = 0,
    target_tile_bytes: int | None = None,
    small_problem_bytes: int = _SMALL_PROBLEM_BYTES,
) -> jnp.ndarray:
    B, S, D = x.shape
    assert pe.shape == (S, D)
    assert 0.0 <= dropout_rate < 1.0

    # Match dtypes so the kernel does a single-precision-domain add/store.
    pe = pe.astype(x.dtype)
    itemsize = jnp.dtype(x.dtype).itemsize

    default_tile, vmem_limit = _device_tile_budget()
    if target_tile_bytes is None:
        target_tile_bytes = default_tile

    total_bytes = B * S * D * itemsize
    lane_dense_3d = (D % 128 == 0)

    if lane_dense_3d:
        x2, pe2 = x, pe
        if total_bytes <= small_problem_bytes:
            grid = (1, 1)
            x_block, pe_block = (B, S, D), (S, D)
            x_map = lambda s, b, *refs: (0, 0, 0)
            pe_map = lambda s, b, *refs: (0, 0)
        else:
            TS = _choose_seq_tile(S, D, itemsize, target_tile_bytes)
            # Batch innermost -> the pe tile stays resident across the inner
            # batch loop (fetched once per s-tile, not once per batch).
            grid = (pl.cdiv(S, TS), B)
            x_block, pe_block = (1, TS, D), (TS, D)
            x_map = lambda s, b, *refs: (b, s, 0)
            pe_map = lambda s, b, *refs: (s, 0)
        out_shape = jax.ShapeDtypeStruct((B, S, D), x.dtype)
    else:
        # d_model not a multiple of 128: present a lane-dense (B, S*D) view so
        # output stores are full-width vst instead of masked vst.msk.
        N = S * D
        x2 = x.reshape(B, N)
        pe2 = pe.reshape(1, N)
        if total_bytes <= small_problem_bytes:
            grid = (1, 1)
            x_block, pe_block = (B, N), (1, N)
            x_map = lambda t, b, *refs: (0, 0)
            pe_map = lambda t, b, *refs: (0, 0)
        else:
            T = _choose_flat_tile(N, itemsize, target_tile_bytes)
            grid = (pl.cdiv(N, T), B)
            x_block, pe_block = (1, T), (1, T)
            x_map = lambda t, b, *refs: (b, t)
            pe_map = lambda t, b, *refs: (0, t)
        out_shape = jax.ShapeDtypeStruct((B, N), x.dtype)

    x_spec = pl.BlockSpec(x_block, x_map)
    pe_spec = pl.BlockSpec(pe_block, pe_map)
    out_spec = pl.BlockSpec(x_block, x_map)

    cp_kwargs = dict(dimension_semantics=("parallel", "parallel"))
    if vmem_limit is not None:
        cp_kwargs["vmem_limit_bytes"] = int(vmem_limit)
    cparams = pltpu.CompilerParams(**cp_kwargs)

    cost = pl.CostEstimate(
        flops=B * S * D,
        transcendentals=0,
        bytes_accessed=(2 * B * S * D + S * D) * itemsize,
    )

    apply_dropout = training and dropout_rate > 0.0

    if not apply_dropout:
        # nn.Dropout is identity in eval mode (and for p == 0).
        out = pl.pallas_call(
            _pe_add_kernel,
            out_shape=out_shape,
            grid_spec=pltpu.PrefetchScalarGridSpec(
                num_scalar_prefetch=0,
                grid=grid,
                in_specs=[x_spec, pe_spec],
                out_specs=out_spec,
            ),
            compiler_params=cparams,
            cost_estimate=cost,
        )(x2, pe2)
    else:
        kern = functools.partial(_pe_add_dropout_kernel, rate=float(dropout_rate))
        seeds = jnp.asarray([seed], jnp.int32)
        out = pl.pallas_call(
            kern,
            out_shape=out_shape,
            grid_spec=pltpu.PrefetchScalarGridSpec(
                num_scalar_prefetch=1,
                grid=grid,
                in_specs=[x_spec, pe_spec],
                out_specs=out_spec,
            ),
            compiler_params=cparams,
            cost_estimate=cost,
        )(seeds, x2, pe2)

    return out.reshape(B, S, D)


# ----------------------------------------------------------------------------
# Demo / self-test
# ----------------------------------------------------------------------------
if __name__ == "__main__":
    key = jax.random.PRNGKey(0)
    k1, k2, k3 = jax.random.split(key, 3)

    # --- Module-default shape (B=2, S=38, D=32): flattened single-block path -
    batch, seq_len, d_model = 2, 38, 32
    x = jax.random.normal(k1, (batch, seq_len, d_model), dtype=jnp.float32)
    pe_tab = make_positional_encoding(d_model, seq_len)
    ref = x + pe_tab[None, :, :]

    out = positional_encoding_forward(x, pe_tab, dropout_rate=0.2, training=False)
    out = jax.block_until_ready(out)
    assert out.shape == x.shape and out.dtype == x.dtype
    assert jnp.allclose(out, ref, atol=1e-6, rtol=1e-6)

    # --- Tiled 3-D path (D multiple of 128), small shapes, forced tiling ------
    B2, S2, D2 = 2, 64, 128
    x2 = jax.random.normal(k2, (B2, S2, D2), dtype=jnp.float32)
    pe2 = make_positional_encoding(D2, S2)
    out2 = positional_encoding_forward(
        x2, pe2, training=False, target_tile_bytes=16 * 1024, small_problem_bytes=0
    )
    out2 = jax.block_until_ready(out2)
    assert jnp.allclose(out2, x2 + pe2[None, :, :], atol=1e-6, rtol=1e-6)

    # --- Tiled flattened path (D not multiple of 128), forced tiling ----------
    B3, S3, D3 = 2, 64, 32
    x3 = jax.random.normal(k3, (B3, S3, D3), dtype=jnp.float32)
    pe3 = make_positional_encoding(D3, S3)
    out3 = positional_encoding_forward(
        x3, pe3, training=False, target_tile_bytes=4 * 1024, small_problem_bytes=0
    )
    out3 = jax.block_until_ready(out3)
    assert jnp.allclose(out3, x3 + pe3[None, :, :], atol=1e-6, rtol=1e-6)

    # --- Training-mode dropout (hardware PRNG) — only on a real TPU backend ---
    # (pltpu.prng_seed has no CPU/interpret lowering, which caused the previous
    #  failure; nn.Dropout is identity in eval mode so inference parity above
    #  is fully covered everywhere.)
    if jax.default_backend() == "tpu":
        out_tr = positional_encoding_forward(
            x, pe_tab, dropout_rate=0.2, training=True, seed=1234
        )
        out_tr = jax.block_until_ready(out_tr)
        kept = out_tr != 0
        # Kept elements must equal ref / (1 - p); dropped elements are zero.
        assert jnp.allclose(
            jnp.where(kept, out_tr * (1.0 - 0.2), ref), ref, atol=1e-5, rtol=1e-5
        )
        keep_frac = jnp.mean(kept.astype(jnp.float32))
        assert 0.5 < float(keep_frac) < 0.97

    print("KERNEL_OK")
</pallas_src>

<mosaic_0001>
module attributes {stable_mosaic.version = 11 : i64} {
  func.func @_pe_add_kernel(%arg0: i32, %arg1: i32, %arg2: memref<2x1216xf32, #tpu.memory_space<vmem>>, %arg3: memref<1x1216xf32, #tpu.memory_space<vmem>>, %arg4: memref<2x1216xf32, #tpu.memory_space<vmem>>) attributes {dimension_semantics = [#tpu.dimension_semantics<parallel>, #tpu.dimension_semantics<parallel>], iteration_bounds = array<i64: 1, 1>, scalar_prefetch = 0 : i64, scratch_operands = 0 : i64, tpu.core_type = #tpu.core_type<tc>, window_params = [{pipeline_mode = #tpu.pipeline_mode<synchronous>, transform_indices = @transform_0, window_bounds = array<i64: 2, 1216>}, {pipeline_mode = #tpu.pipeline_mode<synchronous>, transform_indices = @transform_1, window_bounds = array<i64: 1, 1216>}, {pipeline_mode = #tpu.pipeline_mode<synchronous>, transform_indices = @transform_2, window_bounds = array<i64: 2, 1216>}]} {
    %c0 = arith.constant 0 : index
    %c0_0 = arith.constant 0 : index
    %0 = vector.load %arg2[%c0, %c0_0] : memref<2x1216xf32, #tpu.memory_space<vmem>>, vector<2x1216xf32>
    %c0_1 = arith.constant 0 : index
    %c0_2 = arith.constant 0 : index
    %1 = vector.load %arg3[%c0_1, %c0_2] : memref<1x1216xf32, #tpu.memory_space<vmem>>, vector<1x1216xf32>
    %2 = vector.broadcast %1 : vector<1x1216xf32> to vector<2x1216xf32>
    %3 = arith.addf %0, %2 : vector<2x1216xf32>
    %c0_3 = arith.constant 0 : index
    %c0_4 = arith.constant 0 : index
    %4 = vector.load %arg4[%c0_3, %c0_4] : memref<2x1216xf32, #tpu.memory_space<vmem>>, vector<2x1216xf32>
    tpu.vector_store %arg4[%c0_3, %c0_4], %3 {strides = array<i32>} : memref<2x1216xf32, #tpu.memory_space<vmem>>, vector<2x1216xf32>,
    return
  }
  func.func @transform_0(%arg0: i32, %arg1: i32) -> (i32, i32) {
    %c0_i32 = arith.constant 0 : i32
    %c0_i32_0 = arith.constant 0 : i32
    %c0_i32_1 = arith.constant 0 : i32
    return %c0_i32, %c0_i32_0 : i32, i32
  }
  func.func @transform_1(%arg0: i32, %arg1: i32) -> (i32, i32) {
    %c0_i32 = arith.constant 0 : i32
    %c0_i32_0 = arith.constant 0 : i32
    %c0_i32_1 = arith.constant 0 : i32
    return %c0_i32, %c0_i32_0 : i32, i32
  }
  func.func @transform_2(%arg0: i32, %arg1: i32) -> (i32, i32) {
    %c0_i32 = arith.constant 0 : i32
    %c0_i32_0 = arith.constant 0 : i32
    %c0_i32_1 = arith.constant 0 : i32
    return %c0_i32, %c0_i32_0 : i32, i32
  }
}

</mosaic_0001>

<bundles_post_ra>
// kernel: tpu_custom_call.1
= control target key start
LH: loop header
LB: loop body
LE: loop exit
PB: predicated region body
PF: predicated region fallthrough
CT: control target
= control target key end

     0   :  { %7 = vsyncpa [#allocation3], 0  ;;  %s252_s0 = inlined_call_operand.hbm [shape: f32[2,1216], index: 0, kind: input, shape index: {}]   ;;  %s253_s1 = inlined_call_operand.hbm [shape: f32[1,1216], index: 1, kind: input, shape index: {}]   ;;  %s254_s2 = inlined_call_operand.hbm [shape: f32[2,1216], index: 2, kind: output, shape index: {}]  }
   0x1   :  { %8 = vsyncpa [#allocation6], 0 }
   0x2   :  { %9 = vsyncpa [#allocation4], 0  ;;  %s223_s9 = smov [#allocation2]   ;;  %s224_s11 = smov [#allocation5]  }
   0x3   :  { %s16_s10 = sshll.u32 %s223_s9, 4  ;;  %s26_s12 = sshll.u32 %s224_s11, 4  ;;  %s17_s10 = int_to_ptr.vmem [resolvable:$true] %s16_s10  ;;  %s27_s12 = int_to_ptr.vmem [resolvable:$true] %s26_s12 }
   0x4   :  { %s165_s13 = scalar_lea.vmem %s17_s10, 320  ;;  %p170_p1 = scmp.lt.s32.totalorder %s17_s10, %s17_s10 }
   0x5   :  { %p166_p0 = scmp.ne.s32.totalorder %s17_s10, %s165_s13  ;;  %p171_p2 = scmp.lt.s32.totalorder %s165_s13, %s165_s13 }
   0x7   :  { %p172_p3 = por %p171_p2, %p170_p1 }
   0x9   :  { %p173_p4 = pnand %p172_p3, %p166_p0 }
   0xb   :  { %176 = shalt.err (!%p173_p4)
}
   0xc   :  { %19 = dma.hbm_to_vmem [thread:$0]  %s252_s0, 320, %s17_s10, [#allocation3]  }
   0xd   :  { %s185_s16 = scalar_lea.vmem %s27_s12, 160  ;;  %p190_p6 = scmp.lt.s32.totalorder %s27_s12, %s27_s12 }
   0xe   :  { %p186_p5 = scmp.ne.s32.totalorder %s27_s12, %s185_s16  ;;  %p191_p7 = scmp.lt.s32.totalorder %s185_s16, %s185_s16 }
  0x10   :  { %p192_p8 = por %p191_p7, %p190_p6 }
  0x12   :  { %p193_p9 = pnand %p192_p8, %p186_p5 }
  0x14   :  { %196 = shalt.err (!%p193_p9)
}
  0x15   :  { %29 = dma.hbm_to_vmem [thread:$0]  %s253_s1, 160, %s27_s12, [#allocation6]  }
  0x16   :  { %217 = dma.done.wait [#allocation3], 320  }
  0x17   :  { %218 = vsyncadd [#allocation3], 4294966976 }
  0x18   :  { %219 = dma.done.wait [#allocation6], 160  }
  0x19   :  { %220 = vsyncadd [#allocation6], 4294967136  ;;  %v43_v0 = vlaneseq  ;;  %v225_v1 = vmov 1983009808   ;;  %v39_v13 = vld [vmem:[#allocation5] sm:$0xff]  ;;  %vm133_vm0 = vcmask 1041408  }
  0x1a   :  { %v86_v2 = vunpack.c.l.s4 %v225_v1  ;;  %v40_v19 = vld [vmem:[#allocation5 + $0x8] sm:$0x3]  ;;  %vm134_vm1 = vcmask 519170   ;;  %v36_v33 = vld [vmem:[#allocation2] sm:$0xff]  ;;  %v38_v36 = vld [vmem:[#allocation2 + $0x10] sm:$0xf] }
  0x1b   :  { %v44_v3 = vshrl.u32 %v43_v0, 7  ;;  %v37_v38 = vld [vmem:[#allocation2 + $0x8] sm:$0xff]  ;;  %s226_s0 = smov [#allocation7]   ;;  %vm135_vm2 = vmor %vm134_vm1, %vm133_vm0 }
  0x1c   :  { %v87_v4 = vunpack.c.0.s8 %v86_v2  ;;  %s143_s1 = sshll.u32 %s226_s0, 4  ;;  %s144_s1 = int_to_ptr.vmem [resolvable:$true] %s143_s1 }
  0x1d   :  { %v45_v5 = vsub.s32 0, %v44_v3  ;;  %v49_v6 = vsub.s32 1, %v44_v3  ;;  %v53_v7 = vsub.s32 2, %v44_v3  ;;  %v57_v8 = vsub.s32 3, %v44_v3  ;;  %s197_s19 = scalar_lea.vmem %s144_s1, 320  ;;  %p202_p11 = scmp.lt.s32.totalorder %s144_s1, %s144_s1 }
  0x1e   :  { %v61_v9 = vsub.s32 4, %v44_v3  ;;  %v65_v10 = vsub.s32 5, %v44_v3  ;;  %v69_v11 = vsub.s32 6, %v44_v3  ;;  %v73_v12 = vsub.s32 7, %v44_v3  ;;  %p198_p10 = scmp.ne.s32.totalorder %s144_s1, %s197_s19  ;;  %p203_p12 = scmp.lt.s32.totalorder %s197_s19, %s197_s19 }
  0x1f   :  { %v90_v14 = vsub.s32 %v87_v4, %v44_v3  ;;  %v46_v15 = vrot.slane %v39_v13, %v45_v5  ;;  %v50_v16 = vrot.slane %v39_v13, %v49_v6  ;;  %v54_v17 = vrot.slane %v39_v13, %v53_v7 }
  0x20   :  { %v58_v18 = vrot.slane %v39_v13, %v57_v8  ;;  %v62_v20 = vrot.slane %v39_v13, %v61_v9  ;;  %v66_v21 = vrot.slane %v39_v13, %v65_v10  ;;  %v70_v22 = vrot.slane %v39_v13, %v69_v11  ;;  %p204_p13 = por %p203_p12, %p202_p11 }
  0x21   :  { %v74_v23 = vrot.slane %v39_v13, %v73_v12  ;;  %v83_v24 = vcombine.low %v46_v15, %v50_v16  ;;  %v78_v26 = vrot.slane %v40_v19, %v45_v5  ;;  %v82_v27 = vrot.slane %v40_v19, %v49_v6 }
  0x22   :  { %v84_v25 = vcombine.low %v54_v17, %v58_v18  ;;  %v100_v28 = vcombine.low %v62_v20, %v66_v21  ;;  %p205_p0 = pnand %p204_p13, %p198_p10 }
  0x23   :  { %v101_v29 = vcombine.low %v70_v22, %v74_v23  ;;  %v91_v30 = vrot.slane %v83_v24, %v90_v14  ;;  %v117_v32 = vcombine.low %v78_v26, %v82_v27 }
  0x24   :  { %v98_v31 = vrot.slane %v84_v25, %v90_v14  ;;  %v108_v34 = vrot.slane %v100_v28, %v90_v14 }
  0x25   :  { %v115_v35 = vrot.slane %v101_v29, %v90_v14  ;;  %v124_v39 = vrot.slane %v117_v32, %v90_v14 }
  0x26   :  { %v99_v37 = vcombine.low %v91_v30, %v98_v31 }
  0x27   :  { %v116_v40 = vcombine.low %v108_v34, %v115_v35  ;;  %v130_v42 = vadd.f32 %v124_v39, %v38_v36 }
  0x28   :  { %v128_v41 = vadd.f32 %v99_v37, %v36_v33 }
  0x29   :  { %v129_v43 = vadd.f32 %v116_v40, %v37_v38  ;;  %136 = vst.msk [vmem:[#allocation7 + $0x10] sm:$0xf] %vm135_vm2, %v130_v42 }
  0x2a   :  { %131 = vst [vmem:[#allocation7] sm:$0xff] %v128_v41 }
  0x2b   :  { %132 = vst [vmem:[#allocation7 + $0x8] sm:$0xff] %v129_v43 }
  0x2c   :  { %208 = shalt.err (!%p205_p0)
}
  0x2d   :  { %146 = dma.vmem_to_hbm [thread:$0]  %s144_s1, 320, %s254_s2, [#allocation4]  }
  0x2e   :  { %221 = dma.done.wait [#allocation4], 320  }
  0x2f   :  { %222 = vsyncadd [#allocation4], 4294966976 }
  0x30   :  { %150 = vsyncpa [#allocation3], 1 }
  0x31   :  { %151 = vsyncpa [#allocation6], 1 }
  0x32   :  { %152 = vsyncpa [#allocation4], 1 }

</bundles_post_ra>
